<compile_context>
chip_gen: v7x
topology: tpu7x:2x2x1
jax: 0.10.0
libtpu: 0.0.40
codegen_flags: <defaults>
</compile_context>

<pallas_src>
import functools
import math

import jax
import jax.numpy as jnp
from jax import lax
from jax.experimental import pallas as pl
from jax.experimental.pallas import tpu as pltpu

EPS = 1e-5
_MIB = 1024 * 1024


def _bn_scale_shift(mean, var, gamma, beta):
    # Fused BN affine: y = h * s + t   (rsqrt rides the EUP slot)
    s = gamma * lax.rsqrt(jnp.maximum(var, 0.0) + EPS)
    t = beta - mean * s
    return s, t


def _final_dot(w3t, a2, b3):
    # (8, H) contracted with (rows, H) on H -> (8, rows): lane-dense output, row 0 useful.
    y = lax.dot_general(w3t, a2, (((1,), (1,)), ((), ())),
                        preferred_element_type=jnp.float32)
    return y + b3  # b3 is (1, 1) -> broadcast


# -----------------------------------------------------------------------------
# Grid-less fully fused kernel (whole batch resident in VMEM) -- small batches.
# -----------------------------------------------------------------------------
def _fused_kernel(x_ref, w1_ref, g1_ref, be1_ref, w2_ref, g2_ref, be2_ref,
                  w3t_ref, b3_ref, out_ref):
    inv_n = 1.0 / x_ref.shape[0]
    x = x_ref[...].astype(jnp.bfloat16)          # in-kernel cast (no extra XLA pass)

    z1 = jnp.dot(x, w1_ref[...], preferred_element_type=jnp.float32)
    m1 = jnp.sum(z1, axis=0, keepdims=True) * inv_n
    v1 = jnp.sum(z1 * z1, axis=0, keepdims=True) * inv_n - m1 * m1
    s1, t1 = _bn_scale_shift(m1, v1, g1_ref[...], be1_ref[...])
    a1 = jnp.maximum(z1 * s1 + t1, 0.0).astype(jnp.bfloat16)

    z2 = jnp.dot(a1, w2_ref[...], preferred_element_type=jnp.float32)
    m2 = jnp.sum(z2, axis=0, keepdims=True) * inv_n
    v2 = jnp.sum(z2 * z2, axis=0, keepdims=True) * inv_n - m2 * m2
    s2, t2 = _bn_scale_shift(m2, v2, g2_ref[...], be2_ref[...])
    a2 = jnp.maximum(z2 * s2 + t2, 0.0).astype(jnp.bfloat16)

    out_ref[...] = _final_dot(w3t_ref[...], a2, b3_ref[...])


# -----------------------------------------------------------------------------
# Tiled path, call 1: BN1 / BN2 full-batch sum & sum-of-squares.
# grid = (2 phases, num_tiles); outputs are four resident (1, H) accumulators,
# written back to HBM exactly once at the end (no per-tile output traffic).
# -----------------------------------------------------------------------------
def _stats_kernel(x_ref, w1_ref, g1_ref, be1_ref, w2_ref,
                  s1_ref, ss1_ref, s2_ref, ss2_ref, *, inv_n, batch, need_mask):
    phase = pl.program_id(0)
    tile = pl.program_id(1)

    @pl.when((phase == 0) & (tile == 0))
    def _():
        s1_ref[...] = jnp.zeros_like(s1_ref)
        ss1_ref[...] = jnp.zeros_like(ss1_ref)
        s2_ref[...] = jnp.zeros_like(s2_ref)
        ss2_ref[...] = jnp.zeros_like(ss2_ref)

    x = x_ref[...].astype(jnp.bfloat16)
    z1 = jnp.dot(x, w1_ref[...], preferred_element_type=jnp.float32)

    @pl.when(phase == 0)
    def _():
        # Zero-padded rows give exact-zero z1 rows (no pre-BN bias) -> no mask needed.
        s1_ref[...] += jnp.sum(z1, axis=0, keepdims=True)
        ss1_ref[...] += jnp.sum(z1 * z1, axis=0, keepdims=True)

    @pl.when(phase == 1)
    def _():
        m1 = s1_ref[...] * inv_n
        v1 = ss1_ref[...] * inv_n - m1 * m1
        sc1, sh1 = _bn_scale_shift(m1, v1, g1_ref[...], be1_ref[...])
        a1 = jnp.maximum(z1 * sc1 + sh1, 0.0)
        if need_mask:  # static: only when the batch was zero-padded
            tile_b = x_ref.shape[0]
            row = tile * tile_b + lax.broadcasted_iota(jnp.int32, (tile_b, 1), 0)
            a1 = jnp.where(row < batch, a1, 0.0)
        a1 = a1.astype(jnp.bfloat16)
        z2 = jnp.dot(a1, w2_ref[...], preferred_element_type=jnp.float32)
        s2_ref[...] += jnp.sum(z2, axis=0, keepdims=True)
        ss2_ref[...] += jnp.sum(z2 * z2, axis=0, keepdims=True)


# -----------------------------------------------------------------------------
# Tiled path, call 2: finalize (BN1 -> ReLU -> Linear2 -> BN2 -> ReLU -> Linear3).
# grid = (num_tiles,), embarrassingly parallel over batch tiles -> "parallel"
# (v7x dual-TC). Output is a lane-dense (8, tile_b) block per tile.
# -----------------------------------------------------------------------------
def _finalize_kernel(x_ref, w1_ref, g1_ref, be1_ref, w2_ref, g2_ref, be2_ref,
                     w3t_ref, b3_ref, s1_ref, ss1_ref, s2_ref, ss2_ref,
                     out_ref, *, inv_n):
    x = x_ref[...].astype(jnp.bfloat16)
    z1 = jnp.dot(x, w1_ref[...], preferred_element_type=jnp.float32)
    m1 = s1_ref[...] * inv_n
    v1 = ss1_ref[...] * inv_n - m1 * m1
    sc1, sh1 = _bn_scale_shift(m1, v1, g1_ref[...], be1_ref[...])
    a1 = jnp.maximum(z1 * sc1 + sh1, 0.0).astype(jnp.bfloat16)

    z2 = jnp.dot(a1, w2_ref[...], preferred_element_type=jnp.float32)
    m2 = s2_ref[...] * inv_n
    v2 = ss2_ref[...] * inv_n - m2 * m2
    sc2, sh2 = _bn_scale_shift(m2, v2, g2_ref[...], be2_ref[...])
    a2 = jnp.maximum(z2 * sc2 + sh2, 0.0).astype(jnp.bfloat16)

    out_ref[...] = _final_dot(w3t_ref[...], a2, b3_ref[...])


# -----------------------------------------------------------------------------
# Footprint-based tile sizing & VMEM limits (right-sized, not a blanket 48 MiB).
# -----------------------------------------------------------------------------
def _weights_bytes(d_in, H):
    return 2 * ((d_in * H + H * H + 8 * H) * 2 + 10 * H * 4 + 8)


def _tile_footprint_bytes(tile_b, d_in, H):
    io = 2 * tile_b * d_in * 4 + 2 * 8 * tile_b * 4            # double-buffered x, out
    tmp = tile_b * d_in * 2 + 2 * tile_b * H * 4 + 2 * tile_b * H * 2  # x_bf16, z1/z2, a1/a2
    return io + tmp + _weights_bytes(d_in, H)


def _gridless_footprint_bytes(B, d_in, H):
    return (B * d_in * 4 + B * d_in * 2 + 2 * B * H * 4 + 2 * B * H * 2
            + 8 * B * 4 + _weights_bytes(d_in, H))


def _vmem_limit(footprint_bytes):
    return int(max(8 * _MIB, min(int(footprint_bytes * 1.5) + _MIB, 100 * _MIB)))


def _pick_tile_b(d_in, H, max_tile, budget=28 * _MIB):
    for cand in (8192, 4096, 2048, 1024, 512, 256, 128):
        if cand <= max_tile and _tile_footprint_bytes(cand, d_in, H) <= budget:
            return cand
    return 128


# -----------------------------------------------------------------------------
# Parameter preparation (one-time; hoists casts / pads out of the hot path).
# -----------------------------------------------------------------------------
def prepare_params(p):
    H = p["w1"].shape[1]
    w3t = jnp.zeros((8, H), jnp.bfloat16).at[0:1, :].set(p["w3"].T.astype(jnp.bfloat16))
    return {
        "w1": p["w1"].astype(jnp.bfloat16),
        "w2": p["w2"].astype(jnp.bfloat16),
        "w3t": w3t,                                   # transposed + padded to 8 sublanes
        "b3": p["b3"].astype(jnp.float32).reshape(1, 1),
        "g1": p["g1"], "be1": p["be1"],
        "g2": p["g2"], "be2": p["be2"],
        # b1/b2 intentionally unused: training-mode BN batch-mean subtraction cancels them.
    }


def discriminator_forward(x, prep, *, max_tile=4096):
    """x: (B, input_dim) float32, prep: prepare_params(raw) -> (B, 1) float32."""
    B, d_in = x.shape
    H = prep["w1"].shape[1]
    max_tile = max(int(max_tile), 128)

    gridless_fp = _gridless_footprint_bytes(B, d_in, H)
    if B <= max_tile and gridless_fp <= 24 * _MIB:
        vmem = pl.BlockSpec(memory_space=pltpu.MemorySpace.VMEM)
        out = pl.pallas_call(
            _fused_kernel,
            out_shape=jax.ShapeDtypeStruct((8, B), jnp.float32),
            in_specs=[vmem] * 9,
            out_specs=vmem,
            compiler_params=pltpu.CompilerParams(
                vmem_limit_bytes=_vmem_limit(gridless_fp)),
        )(x, prep["w1"], prep["g1"], prep["be1"], prep["w2"], prep["g2"],
          prep["be2"], prep["w3t"], prep["b3"])
        return out[0, :B].reshape(B, 1)

    # ---- tiled path: stats pass + finalize pass (full-batch BN statistics) ----
    tile_b = _pick_tile_b(d_in, H, max_tile)
    num_tiles = (B + tile_b - 1) // tile_b
    b_pad = num_tiles * tile_b
    need_mask = b_pad != B
    xp = jnp.pad(x, ((0, b_pad - B), (0, 0))) if need_mask else x
    inv_n = 1.0 / B
    limit = _vmem_limit(_tile_footprint_bytes(tile_b, d_in, H))

    vec2 = pl.BlockSpec((1, H), lambda p, t: (0, 0))
    s1, ss1, s2, ss2 = pl.pallas_call(
        functools.partial(_stats_kernel, inv_n=inv_n, batch=B, need_mask=need_mask),
        out_shape=tuple(jax.ShapeDtypeStruct((1, H), jnp.float32) for _ in range(4)),
        grid_spec=pltpu.PrefetchScalarGridSpec(
            num_scalar_prefetch=0,
            grid=(2, num_tiles),
            in_specs=[
                pl.BlockSpec((tile_b, d_in), lambda p, t: (t, 0)),   # x tiles
                pl.BlockSpec((d_in, H), lambda p, t: (0, 0)),        # w1
                vec2, vec2,                                          # gamma1, beta1
                pl.BlockSpec((H, H), lambda p, t: (0, 0)),           # w2
            ],
            out_specs=[vec2] * 4,
        ),
        compiler_params=pltpu.CompilerParams(
            # stat accumulators carry across both grid axes -> sequential
            dimension_semantics=("arbitrary", "arbitrary"),
            vmem_limit_bytes=limit),
    )(xp, prep["w1"], prep["g1"], prep["be1"], prep["w2"])

    vec1 = pl.BlockSpec((1, H), lambda t: (0, 0))
    out = pl.pallas_call(
        functools.partial(_finalize_kernel, inv_n=inv_n),
        out_shape=jax.ShapeDtypeStruct((8, b_pad), jnp.float32),
        grid_spec=pltpu.PrefetchScalarGridSpec(
            num_scalar_prefetch=0,
            grid=(num_tiles,),
            in_specs=[
                pl.BlockSpec((tile_b, d_in), lambda t: (t, 0)),      # x tiles
                pl.BlockSpec((d_in, H), lambda t: (0, 0)),           # w1
                vec1, vec1,                                          # gamma1, beta1
                pl.BlockSpec((H, H), lambda t: (0, 0)),              # w2
                vec1, vec1,                                          # gamma2, beta2
                pl.BlockSpec((8, H), lambda t: (0, 0)),              # w3 (transposed+padded)
                pl.BlockSpec((1, 1), lambda t: (0, 0)),              # b3
                vec1, vec1, vec1, vec1,                              # s1, ss1, s2, ss2
            ],
            out_specs=pl.BlockSpec((8, tile_b), lambda t: (0, t)),   # lane-dense output
        ),
        compiler_params=pltpu.CompilerParams(
            dimension_semantics=("parallel",),   # v7x: batch tiles split across both TCs
            vmem_limit_bytes=limit),
    )(xp, prep["w1"], prep["g1"], prep["be1"], prep["w2"], prep["g2"],
      prep["be2"], prep["w3t"], prep["b3"], s1, ss1, s2, ss2)
    return out[0, :B].reshape(B, 1)


# -----------------------------------------------------------------------------
# Parameters & references
# -----------------------------------------------------------------------------
def init_params(key, input_dim, hidden_dim):
    ks = jax.random.split(key, 10)

    def lin(kw, kb, fan_in, fan_out):
        bound = 1.0 / math.sqrt(fan_in)
        w = jax.random.uniform(kw, (fan_in, fan_out), jnp.float32, -bound, bound)
        b = jax.random.uniform(kb, (1, fan_out), jnp.float32, -bound, bound)
        return w, b

    w1, b1 = lin(ks[0], ks[1], input_dim, hidden_dim)
    w2, b2 = lin(ks[2], ks[3], hidden_dim, hidden_dim)
    w3, b3 = lin(ks[4], ks[5], hidden_dim, 1)
    return {
        "w1": w1, "b1": b1,
        "g1": 1.0 + 0.1 * jax.random.normal(ks[6], (1, hidden_dim), jnp.float32),
        "be1": 0.1 * jax.random.normal(ks[7], (1, hidden_dim), jnp.float32),
        "w2": w2, "b2": b2,
        "g2": 1.0 + 0.1 * jax.random.normal(ks[8], (1, hidden_dim), jnp.float32),
        "be2": 0.1 * jax.random.normal(ks[9], (1, hidden_dim), jnp.float32),
        "w3": w3, "b3": b3,
    }


def reference_f32(x, p):
    """Faithful f32 reference of the PyTorch module (training-mode BN, with
    gamma/beta affine and the pre-BN linear biases)."""
    def bn(h, g, b):
        m = jnp.mean(h, axis=0, keepdims=True)
        v = jnp.mean((h - m) ** 2, axis=0, keepdims=True)
        return (h - m) / jnp.sqrt(v + EPS) * g + b

    h = jnp.maximum(bn(x @ p["w1"] + p["b1"], p["g1"], p["be1"]), 0.0)
    h = jnp.maximum(bn(h @ p["w2"] + p["b2"], p["g2"], p["be2"]), 0.0)
    return h @ p["w3"] + p["b3"]


def reference_bf16(x, p):
    """Mirror of the kernel's numerics (bf16 matmul operands, f32 accumulation,
    f32 BN). Keeps b1/b2 to verify they cancel under batch-mean subtraction."""
    def dot(a, b):
        return jnp.dot(a.astype(jnp.bfloat16), b.astype(jnp.bfloat16),
                       preferred_element_type=jnp.float32)

    def bn_relu(h, g, b):
        m = jnp.mean(h, axis=0, keepdims=True)
        v = jnp.mean((h - m) ** 2, axis=0, keepdims=True)
        return jnp.maximum((h - m) * lax.rsqrt(v + EPS) * g + b, 0.0)

    h = bn_relu(dot(x, p["w1"]) + p["b1"], p["g1"], p["be1"])
    h = bn_relu(dot(h, p["w2"]) + p["b2"], p["g2"], p["be2"])
    return dot(h, p["w3"]) + p["b3"]


if __name__ == "__main__":
    INPUT_DIM, HIDDEN = 32, 128

    key = jax.random.PRNGKey(0)
    kx1, kx2, kx3, kp = jax.random.split(key, 4)
    params = init_params(kp, INPUT_DIM, HIDDEN)
    prep = prepare_params(params)

    def check(x, out, tag):
        eb = float(jnp.max(jnp.abs(out - reference_bf16(x, params))))
        ef = float(jnp.max(jnp.abs(out - reference_f32(x, params))))
        assert eb < 1e-2, f"{tag} vs bf16-matched ref: max abs err {eb}"
        assert ef < 1.5e-1, f"{tag} vs f32 ref: max abs err {ef}"

    # ---- small batch: grid-less fully fused path ----
    B1 = 8
    x1 = jax.random.normal(kx1, (B1, INPUT_DIM), dtype=jnp.float32)
    out1 = jax.block_until_ready(discriminator_forward(x1, prep))
    assert out1.shape == (B1, 1)
    check(x1, out1, "fused path")

    # ---- non-divisible batch: tiled 2-pass path with zero-pad + mask ----
    B2 = 300
    x2 = jax.random.normal(kx2, (B2, INPUT_DIM), dtype=jnp.float32)
    out2 = jax.block_until_ready(discriminator_forward(x2, prep, max_tile=128))
    assert out2.shape == (B2, 1)
    check(x2, out2, "tiled (padded) path")

    # ---- divisible batch: tiled 2-pass path, no padding ----
    B3 = 512
    x3 = jax.random.normal(kx3, (B3, INPUT_DIM), dtype=jnp.float32)
    out3 = jax.block_until_ready(discriminator_forward(x3, prep, max_tile=256))
    assert out3.shape == (B3, 1)
    check(x3, out3, "tiled path")

    print("KERNEL_OK")
</pallas_src>

<mosaic_0001>
module attributes {stable_mosaic.version = 11 : i64} {
  func.func @_fused_kernel(%arg0: memref<8x32xf32, #tpu.memory_space<vmem>>, %arg1: memref<32x128xbf16, #tpu.memory_space<vmem>>, %arg2: memref<1x128xf32, #tpu.memory_space<vmem>>, %arg3: memref<1x128xf32, #tpu.memory_space<vmem>>, %arg4: memref<128x128xbf16, #tpu.memory_space<vmem>>, %arg5: memref<1x128xf32, #tpu.memory_space<vmem>>, %arg6: memref<1x128xf32, #tpu.memory_space<vmem>>, %arg7: memref<8x128xbf16, #tpu.memory_space<vmem>>, %arg8: memref<1x1xf32, #tpu.memory_space<vmem>>, %arg9: memref<8x8xf32, #tpu.memory_space<vmem>>) attributes {dimension_semantics = [], scalar_prefetch = 0 : i64, scratch_operands = 0 : i64, tpu.core_type = #tpu.core_type<tc>} {
    %c0 = arith.constant 0 : index
    %c0_0 = arith.constant 0 : index
    %0 = vector.load %arg0[%c0, %c0_0] : memref<8x32xf32, #tpu.memory_space<vmem>>, vector<8x32xf32>
    %1 = arith.truncf %0 : vector<8x32xf32> to vector<8x32xbf16>
    %c0_1 = arith.constant 0 : index
    %c0_2 = arith.constant 0 : index
    %2 = vector.load %arg1[%c0_1, %c0_2] : memref<32x128xbf16, #tpu.memory_space<vmem>>, vector<32x128xbf16>
    %cst = arith.constant dense<0.000000e+00> : vector<8x128xf32>
    %3 = tpu.matmul %1, %2, %cst {dimension_numbers = #tpu.dot_dimension_numbers<[1], [0], [0], [1], [0, 0, 1, 1], [], []>} : vector<8x32xbf16>, vector<32x128xbf16>, vector<8x128xf32> -> vector<8x128xf32>
    %cst_3 = arith.constant dense<0.000000e+00> : vector<128xf32>
    %4 = vector.multi_reduction <add>, %3, %cst_3 [0] : vector<8x128xf32> to vector<128xf32>
    %5 = vector.shape_cast %4 : vector<128xf32> to vector<1x128xf32>
    %cst_4 = arith.constant 1.250000e-01 : f32
    %6 = vector.broadcast %cst_4 : f32 to vector<1x128xf32>
    %7 = arith.mulf %5, %6 : vector<1x128xf32>
    %8 = arith.mulf %3, %3 : vector<8x128xf32>
    %cst_5 = arith.constant dense<0.000000e+00> : vector<128xf32>
    %9 = vector.multi_reduction <add>, %8, %cst_5 [0] : vector<8x128xf32> to vector<128xf32>
    %10 = vector.shape_cast %9 : vector<128xf32> to vector<1x128xf32>
    %cst_6 = arith.constant 1.250000e-01 : f32
    %11 = vector.broadcast %cst_6 : f32 to vector<1x128xf32>
    %12 = arith.mulf %10, %11 : vector<1x128xf32>
    %13 = arith.mulf %7, %7 : vector<1x128xf32>
    %14 = arith.subf %12, %13 : vector<1x128xf32>
    %c0_7 = arith.constant 0 : index
    %c0_8 = arith.constant 0 : index
    %15 = vector.load %arg2[%c0_7, %c0_8] : memref<1x128xf32, #tpu.memory_space<vmem>>, vector<1x128xf32>
    %c0_9 = arith.constant 0 : index
    %c0_10 = arith.constant 0 : index
    %16 = vector.load %arg3[%c0_9, %c0_10] : memref<1x128xf32, #tpu.memory_space<vmem>>, vector<1x128xf32>
    %cst_11 = arith.constant 0.000000e+00 : f32
    %17 = vector.broadcast %cst_11 : f32 to vector<1x128xf32>
    %18 = arith.maximumf %14, %17 : vector<1x128xf32>
    %cst_12 = arith.constant 9.99999974E-6 : f32
    %19 = vector.broadcast %cst_12 : f32 to vector<1x128xf32>
    %20 = arith.addf %18, %19 : vector<1x128xf32>
    %21 = math.rsqrt %20 : vector<1x128xf32>
    %22 = arith.mulf %15, %21 : vector<1x128xf32>
    %23 = arith.mulf %7, %22 : vector<1x128xf32>
    %24 = arith.subf %16, %23 : vector<1x128xf32>
    %25 = vector.broadcast %22 : vector<1x128xf32> to vector<8x128xf32>
    %26 = arith.mulf %3, %25 : vector<8x128xf32>
    %27 = vector.broadcast %24 : vector<1x128xf32> to vector<8x128xf32>
    %28 = arith.addf %26, %27 : vector<8x128xf32>
    %cst_13 = arith.constant 0.000000e+00 : f32
    %29 = vector.broadcast %cst_13 : f32 to vector<8x128xf32>
    %30 = arith.maximumf %28, %29 : vector<8x128xf32>
    %31 = arith.truncf %30 : vector<8x128xf32> to vector<8x128xbf16>
    %c0_14 = arith.constant 0 : index
    %c0_15 = arith.constant 0 : index
    %32 = vector.load %arg4[%c0_14, %c0_15] : memref<128x128xbf16, #tpu.memory_space<vmem>>, vector<128x128xbf16>
    %cst_16 = arith.constant dense<0.000000e+00> : vector<8x128xf32>
    %33 = tpu.matmul %31, %32, %cst_16 {dimension_numbers = #tpu.dot_dimension_numbers<[1], [0], [0], [1], [0, 0, 1, 1], [], []>} : vector<8x128xbf16>, vector<128x128xbf16>, vector<8x128xf32> -> vector<8x128xf32>
    %cst_17 = arith.constant dense<0.000000e+00> : vector<128xf32>
    %34 = vector.multi_reduction <add>, %33, %cst_17 [0] : vector<8x128xf32> to vector<128xf32>
    %35 = vector.shape_cast %34 : vector<128xf32> to vector<1x128xf32>
    %cst_18 = arith.constant 1.250000e-01 : f32
    %36 = vector.broadcast %cst_18 : f32 to vector<1x128xf32>
    %37 = arith.mulf %35, %36 : vector<1x128xf32>
    %38 = arith.mulf %33, %33 : vector<8x128xf32>
    %cst_19 = arith.constant dense<0.000000e+00> : vector<128xf32>
    %39 = vector.multi_reduction <add>, %38, %cst_19 [0] : vector<8x128xf32> to vector<128xf32>
    %40 = vector.shape_cast %39 : vector<128xf32> to vector<1x128xf32>
    %cst_20 = arith.constant 1.250000e-01 : f32
    %41 = vector.broadcast %cst_20 : f32 to vector<1x128xf32>
    %42 = arith.mulf %40, %41 : vector<1x128xf32>
    %43 = arith.mulf %37, %37 : vector<1x128xf32>
    %44 = arith.subf %42, %43 : vector<1x128xf32>
    %c0_21 = arith.constant 0 : index
    %c0_22 = arith.constant 0 : index
    %45 = vector.load %arg5[%c0_21, %c0_22] : memref<1x128xf32, #tpu.memory_space<vmem>>, vector<1x128xf32>
    %c0_23 = arith.constant 0 : index
    %c0_24 = arith.constant 0 : index
    %46 = vector.load %arg6[%c0_23, %c0_24] : memref<1x128xf32, #tpu.memory_space<vmem>>, vector<1x128xf32>
    %cst_25 = arith.constant 0.000000e+00 : f32
    %47 = vector.broadcast %cst_25 : f32 to vector<1x128xf32>
    %48 = arith.maximumf %44, %47 : vector<1x128xf32>
    %cst_26 = arith.constant 9.99999974E-6 : f32
    %49 = vector.broadcast %cst_26 : f32 to vector<1x128xf32>
    %50 = arith.addf %48, %49 : vector<1x128xf32>
    %51 = math.rsqrt %50 : vector<1x128xf32>
    %52 = arith.mulf %45, %51 : vector<1x128xf32>
    %53 = arith.mulf %37, %52 : vector<1x128xf32>
    %54 = arith.subf %46, %53 : vector<1x128xf32>
    %55 = vector.broadcast %52 : vector<1x128xf32> to vector<8x128xf32>
    %56 = arith.mulf %33, %55 : vector<8x128xf32>
    %57 = vector.broadcast %54 : vector<1x128xf32> to vector<8x128xf32>
    %58 = arith.addf %56, %57 : vector<8x128xf32>
    %cst_27 = arith.constant 0.000000e+00 : f32
    %59 = vector.broadcast %cst_27 : f32 to vector<8x128xf32>
    %60 = arith.maximumf %58, %59 : vector<8x128xf32>
    %61 = arith.truncf %60 : vector<8x128xf32> to vector<8x128xbf16>
    %c0_28 = arith.constant 0 : index
    %c0_29 = arith.constant 0 : index
    %62 = vector.load %arg7[%c0_28, %c0_29] : memref<8x128xbf16, #tpu.memory_space<vmem>>, vector<8x128xbf16>
    %c0_30 = arith.constant 0 : index
    %c0_31 = arith.constant 0 : index
    %63 = vector.load %arg8[%c0_30, %c0_31] : memref<1x1xf32, #tpu.memory_space<vmem>>, vector<1x1xf32>
    %cst_32 = arith.constant dense<0.000000e+00> : vector<8x8xf32>
    %64 = tpu.matmul %62, %61, %cst_32 {dimension_numbers = #tpu.dot_dimension_numbers<[1], [1], [0], [0], [0, 0, 1, 0], [], []>} : vector<8x128xbf16>, vector<8x128xbf16>, vector<8x8xf32> -> vector<8x8xf32>
    %65 = vector.broadcast %63 : vector<1x1xf32> to vector<8x8xf32>
    %66 = arith.addf %64, %65 : vector<8x8xf32>
    %c0_33 = arith.constant 0 : index
    %c0_34 = arith.constant 0 : index
    %67 = vector.load %arg9[%c0_33, %c0_34] : memref<8x8xf32, #tpu.memory_space<vmem>>, vector<8x8xf32>
    tpu.vector_store %arg9[%c0_33, %c0_34], %66 {strides = array<i32>} : memref<8x8xf32, #tpu.memory_space<vmem>>, vector<8x8xf32>,
    return
  }
}

</mosaic_0001>

<bundles_post_ra>
// kernel: tpu_custom_call.1
= control target key start
LH: loop header
LB: loop body
LE: loop exit
PB: predicated region body
PF: predicated region fallthrough
CT: control target
= control target key end

     0   :  { %s701_s0 = inlined_call_operand.hbm [shape: f32[8,32], index: 0, kind: input, shape index: {}]   ;;  %s702_s1 = inlined_call_operand.hbm [shape: bf16[32,128], index: 1, kind: input, shape index: {}]   ;;  %s703_s2 = inlined_call_operand.vmem [shape: f32[1,128], index: 2, kind: input, shape index: {}]   ;;  %s704_s3 = inlined_call_operand.vmem [shape: f32[1,128], index: 3, kind: input, shape index: {}]   ;;  %s705_s4 = inlined_call_operand.hbm [shape: bf16[128,128], index: 4, kind: input, shape index: {}]   ;;  %s706_s5 = inlined_call_operand.vmem [shape: f32[1,128], index: 5, kind: input, shape index: {}]   ;;  %s707_s6 = inlined_call_operand.vmem [shape: f32[1,128], index: 6, kind: input, shape index: {}]   ;;  %s708_s7 = inlined_call_operand.vmem [shape: bf16[8,128], index: 7, kind: input, shape index: {}]   ;;  %s709_s8 = inlined_call_operand.<no memory space> [shape: f32[1,1], index: 8, kind: input, shape index: {}]   ;;  %s710_s9 = inlined_call_operand.hbm [shape: f32[8,8], index: 9, kind: output, shape index: {}]  }
   0x1   :  { %v14_v0 = vstv %s709_s8 }
   0x2   :  { %15 = vst [vmem:[#allocation2] sm:$0x1] %v14_v0 }
   0x3   :  { %16 = vsyncpa [#allocation4], 0 }
   0x4   :  { %17 = vsyncpa [#allocation7], 0 }
   0x5   :  { %18 = vsyncpa [#allocation5], 0  ;;  %s570_s11 = smov [#allocation6]   ;;  %s476_s15 = scalar_lea.hbm %s702_s1, 256 }
   0x6   :  { %s34_s12 = sshll.u32 %s570_s11, 4  ;;  %p477_p0 = scmp.ne.s32.totalorder %s702_s1, %s476_s15  ;;  %s35_s12 = int_to_ptr.vmem [resolvable:$true] %s34_s12 }
   0x7   :  { %p480_p1 = scmp.lt.u32.totalorder %s476_s15, %s702_s1 }
   0x9   :  { %p482_p2 = pnand %p480_p1, %p477_p0 }
   0xb   :  { %485 = shalt.err (!%p482_p2)
}
   0xc   :  { %s486_s8 = scalar_lea.vmem %s35_s12, 256  ;;  %p491_p4 = scmp.lt.s32.totalorder %s35_s12, %s35_s12 }
   0xd   :  { %p487_p3 = scmp.ne.s32.totalorder %s35_s12, %s486_s8  ;;  %p492_p5 = scmp.lt.s32.totalorder %s486_s8, %s486_s8 }
   0xf   :  { %p493_p6 = por %p492_p5, %p491_p4 }
  0x11   :  { %p494_p7 = pnand %p493_p6, %p487_p3 }
  0x13   :  { %497 = shalt.err (!%p494_p7)
}
  0x14   :  { %s571_s20 = smov 64   ;;  %s572_s21 = smov 4  }
  0x15   :  { %40 = dma.hbm_to_vmem [thread:$0]  %s702_s1, 256, %s35_s12, [#allocation7], %s571_s20, %s571_s20, %s572_s21  }
  0x16   :  { %s573_s24 = smov [#allocation3]   ;;  %s574_s26 = smov [#allocation8]  }
  0x17   :  { %s25_s25 = sshll.u32 %s573_s24, 4  ;;  %s50_s27 = sshll.u32 %s574_s26, 4  ;;  %s26_s25 = int_to_ptr.vmem [resolvable:$true] %s25_s25  ;;  %s51_s27 = int_to_ptr.vmem [resolvable:$true] %s50_s27 }
  0x18   :  { %s498_s30 = scalar_lea.hbm %s701_s0, 128 }
  0x19   :  { %p499_p8 = scmp.ne.s32.totalorder %s701_s0, %s498_s30  ;;  %p502_p9 = scmp.lt.u32.totalorder %s498_s30, %s701_s0 }
  0x1b   :  { %p504_p10 = pnand %p502_p9, %p499_p8 }
  0x1d   :  { %507 = shalt.err (!%p504_p10)
}
  0x1e   :  { %s508_s1 = scalar_lea.vmem %s26_s25, 128  ;;  %p513_p12 = scmp.lt.s32.totalorder %s26_s25, %s26_s25 }
  0x1f   :  { %p509_p11 = scmp.ne.s32.totalorder %s26_s25, %s508_s1  ;;  %p514_p13 = scmp.lt.s32.totalorder %s508_s1, %s508_s1 }
  0x21   :  { %p515_p0 = por %p514_p13, %p513_p12 }
  0x23   :  { %p516_p1 = pnand %p515_p0, %p509_p11 }
  0x25   :  { %519 = shalt.err (!%p516_p1)
}
  0x26   :  { %28 = dma.hbm_to_vmem [thread:$0]  %s701_s0, 128, %s26_s25, [#allocation4]  }
  0x27   :  { %s520_s18 = scalar_lea.hbm %s705_s4, 1024 }
  0x28   :  { %p521_p2 = scmp.ne.s32.totalorder %s705_s4, %s520_s18  ;;  %p524_p3 = scmp.lt.u32.totalorder %s520_s18, %s705_s4 }
  0x2a   :  { %p526_p4 = pnand %p524_p3, %p521_p2 }
  0x2c   :  { %529 = shalt.err (!%p526_p4)
}
  0x2d   :  { %s530_s24 = scalar_lea.vmem %s51_s27, 1024  ;;  %p535_p6 = scmp.lt.s32.totalorder %s51_s27, %s51_s27 }
  0x2e   :  { %p531_p5 = scmp.ne.s32.totalorder %s51_s27, %s530_s24  ;;  %p536_p7 = scmp.lt.s32.totalorder %s530_s24, %s530_s24 }
  0x30   :  { %p537_p8 = por %p536_p7, %p535_p6 }
  0x32   :  { %p538_p9 = pnand %p537_p8, %p531_p5 }
  0x34   :  { %541 = shalt.err (!%p538_p9)
}
  0x35   :  { %56 = dma.hbm_to_vmem [thread:$0]  %s705_s4, 1024, %s51_s27, [#allocation7], %s571_s20, %s571_s20, %s572_s21  }
  0x36   :  { %564 = dma.done.wait [#allocation4], 128  }
  0x37   :  { %565 = vsyncadd [#allocation4], 4294967168 }
  0x38   :  { %566 = dma.done.wait [#allocation7], 1280  }
  0x39   :  { %567 = vsyncadd [#allocation7], 4294966016  ;;  %v575_v1 = vmov 0.0   ;;  %vm576_vm0 = vmmov 0   ;;  %v462_v2 = vld [vmem:[#allocation6] sm:$0xff]   ;;  %v463_v3 = vld [vmem:[#allocation6 + $0x8] sm:$0xff]   ;;  %v163_v37 = vlaneseq }
  0x3a   :  { %418 = vmatprep.subr.bf16.mxu0 %v575_v1  ;;  %422 = vmatprep.mubr.msk.bf16.mxu0 %vm576_vm0, %v575_v1  ;;  %v75_v4 = vld [vmem:[#allocation3] sm:$0xff]  ;;  %vm93_vm1 = vcmask 261120   ;;  %v464_v6 = vld [vmem:[#allocation8] sm:$0xff]   ;;  %v466_v8 = vld [vmem:[#allocation8 + $0x10] sm:$0xff]   ;;  %v577_v53 = vmov 0   ;;  %vm374_vm2 = vcmask 64512  }
  0x3b   :  { %426 = vmatprep.subr.bf16.mxu1 %v575_v1  ;;  %442 = vmatprep.mubr.msk.bf16.mxu1 %vm576_vm0, %v575_v1  ;;  %v76_v5 = vpack.c.bf16 %v75_v4, %v75_v4  ;;  %v465_v7 = vld [vmem:[#allocation8 + $0x8] sm:$0xff]   ;;  %v467_v9 = vld [vmem:[#allocation8 + $0x18] sm:$0xff]   ;;  %v468_v10 = vld [vmem:[#allocation8 + $0x20] sm:$0xff]   ;;  %v164_v38 = vshrl.u32 %v163_v37, 7 }
  0x3c   :  { %419 = vmatpush3.bf16.msra.mxu0 %v462_v2  ;;  %427 = vmatpush3.bf16.msra.mxu1 %v464_v6  ;;  %v469_v11 = vld [vmem:[#allocation8 + $0x28] sm:$0xff]   ;;  %v470_v12 = vld [vmem:[#allocation8 + $0x30] sm:$0xff]   ;;  %v471_v13 = vld [vmem:[#allocation8 + $0x38] sm:$0xff]  }
  0x3d   :  { %420 = vmatprep.subr.bf16.mxu0 %v575_v1  ;;  %428 = vmatprep.subr.bf16.mxu1 %v575_v1  ;;  %v154_v39 = vld [vmem:[%s703_s2] sm:$0x1]  ;;  %v165_v40 = vsub.s32 0, %v164_v38 }
  0x3e   :  { %v155_v43 = vld [vmem:[%s704_s3] sm:$0x1]  ;;  %461 = vset.pattern.permute.xlu0 %v577_v53 }
  0x3f   :  { %v403_v52 = vld [vmem:[#allocation2] ss:$0 sm:$0xff] }
  0x40   :  { %421 = vmatpush3.bf16.msra.mxu0 %v463_v3  ;;  %429 = vmatpush3.bf16.msra.mxu1 %v465_v7 }
  0x41   :  { %446 = vmatprep.subr.bf16.mxu0 %v575_v1  ;;  %430 = vmatprep.subr.bf16.mxu1 %v575_v1 }
  0x42   :  { %331 = vperm.xlu0 %461, %v403_v52  }
  0x43   :  { %423 = vmatmul.mubr.msk.bf16.vlgmr.msra.gmra.mrb[0].mxu0 %vm93_vm1, %v76_v5 }
  0x44   :  { %448 = vmatprep.mubr.msk.bf16.mxu0 %vm576_vm0, %v575_v1  ;;  %431 = vmatpush3.bf16.msra.mxu1 %v466_v8 }
  0x45   :  { %432 = vmatprep.subr.bf16.mxu1 %v575_v1 }
  0x48   :  { %433 = vmatpush3.bf16.msra.mxu1 %v467_v9 }
  0x49   :  { %434 = vmatprep.subr.bf16.mxu1 %v575_v1 }
  0x4c   :  { %435 = vmatpush3.bf16.msra.mxu1 %v468_v10 }
  0x4d   :  { %436 = vmatprep.subr.bf16.mxu1 %v575_v1 }
  0x50   :  { %437 = vmatpush3.bf16.msra.mxu1 %v469_v11 }
  0x51   :  { %438 = vmatprep.subr.bf16.mxu1 %v575_v1 }
  0x54   :  { %439 = vmatpush3.bf16.msra.mxu1 %v470_v12 }
  0x55   :  { %440 = vmatprep.subr.bf16.mxu1 %v575_v1 }
  0x58   :  { %441 = vmatpush3.bf16.msra.mxu1 %v471_v13  ;;  %v299_v13 = vld [vmem:[%s706_s5] sm:$0x1]  ;;  %s578_s5 = smov [#allocation9]  }
  0x59   :  { %s382_s10 = sshll.u32 %s578_s5, 4  ;;  %s383_s10 = int_to_ptr.vmem [resolvable:$true] %s382_s10 }
  0x5a   :  { %p547_p11 = scmp.lt.s32.totalorder %s383_s10, %s383_s10 }
 0x116   :  { %v131_v14 = vpop.f32.mrb[0].mxu0 }
 0x117   :  { %v137_v15 = vrot.slane %v131_v14, 4  ;;  %v144_v16 = vmul.f32 %v131_v14, %v131_v14  ;;  %v424_v17 = vpop.f32.mrb[1].mxu0 }
 0x118   :  { %v134_v18 = vpop.f32.mrb[2].mxu0 }
 0x119   :  { %v138_v19 = vadd.f32 %v137_v15, %v131_v14  ;;  %v145_v20 = vrot.slane %v144_v16, 4  ;;  %v425_v21 = vpop.f32.mrb[3].mxu0 }
 0x11b   :  { %v139_v22 = vrot.slane %v138_v19, 2  ;;  %v146_v23 = vadd.f32 %v145_v20, %v144_v16  ;;  %v300_v16 = vld [vmem:[%s707_s6] sm:$0x1]  ;;  %s542_s6 = scalar_lea.vmem %s383_s10, 128 }
 0x11c   :  { %p543_p10 = scmp.ne.s32.totalorder %s383_s10, %s542_s6  ;;  %p548_p12 = scmp.lt.s32.totalorder %s542_s6, %s542_s6 }
 0x11d   :  { %v140_v24 = vadd.f32 %v139_v22, %v138_v19  ;;  %v147_v25 = vrot.slane %v146_v23, 2 }
 0x11e   :  { %p549_p13 = por %p548_p12, %p547_p11 }
 0x11f   :  { %v141_v26 = vrot.slane %v140_v24, 1  ;;  %v148_v27 = vadd.f32 %v147_v25, %v146_v23  ;;  %v323_v25 = vld [vmem:[%s708_s7] sm:$0xf] }
 0x120   :  { %p550_p0 = pnand %p549_p13, %p543_p10 }
 0x121   :  { %v142_v28 = vadd.f32 %v141_v26, %v140_v24  ;;  %v149_v29 = vrot.slane %v148_v27, 1  ;;  %v332_v26 = vpop.permute.xlu0 %331 }
 0x123   :  { %v143_v30 = vmul.f32 0.125, %v142_v28  ;;  %v150_v31 = vadd.f32 %v149_v29, %v148_v27 }
 0x125   :  { %v151_v32 = vmul.f32 0.125, %v150_v31  ;;  %v152_v33 = vmul.f32 %v143_v30, %v143_v30 }
 0x127   :  { %v153_v34 = vsub.f32 %v151_v32, %v152_v33 }
 0x129   :  { %v156_v35 = vmax.f32 %v153_v34, 0.0 }
 0x12b   :  { %v157_v36 = vadd.f32 1e-05, %v156_v35 }
 0x12d   :  { %472 = vrsqrt.f32 %v157_v36 }
 0x137   :  { %v473_v41 = vpop.eup %472 }
 0x138   :  { %v159_v42 = vmul.f32 %v473_v41, %v154_v39 }
 0x13a   :  { %v166_v44 = vrot.slane %v159_v42, %v165_v40  ;;  %v160_v45 = vmul.f32 %v159_v42, %v143_v30 }
 0x13c   :  { %v161_v46 = vsub.f32 %v155_v43, %v160_v45  ;;  %v168_v47 = vmul.f32 %v166_v44, %v131_v14 }
 0x13e   :  { %v173_v48 = vrot.slane %v161_v46, %v165_v40 }
 0x140   :  { %v175_v49 = vadd.f32 %v173_v48, %v168_v47 }
 0x142   :  { %v176_v50 = vmax.f32 %v175_v49, 0.0 }
 0x144   :  { %v177_v51 = vpack.c.bf16 %v176_v50, %v176_v50 }
 0x146   :  { %443 = vmatmul.mubr.bf16.vlgmr.msra.gmra.mrb[0].mxu1 %v177_v51 }
 0x219   :  { %v276_v54 = vpop.f32.mrb[0].mxu1 }
 0x21a   :  { %v282_v55 = vrot.slane %v276_v54, 4  ;;  %v289_v56 = vmul.f32 %v276_v54, %v276_v54  ;;  %v444_v57 = vpop.f32.mrb[1].mxu1 }
 0x21b   :  { %v279_v58 = vpop.f32.mrb[2].mxu1 }
 0x21c   :  { %v283_v59 = vadd.f32 %v282_v55, %v276_v54  ;;  %v290_v60 = vrot.slane %v289_v56, 4  ;;  %v445_v61 = vpop.f32.mrb[3].mxu1 }
 0x21e   :  { %v284_v62 = vrot.slane %v283_v59, 2  ;;  %v291_v63 = vadd.f32 %v290_v60, %v289_v56 }
 0x220   :  { %v285_v0 = vadd.f32 %v284_v62, %v283_v59  ;;  %v292_v1 = vrot.slane %v291_v63, 2 }
 0x222   :  { %v286_v2 = vrot.slane %v285_v0, 1  ;;  %v293_v3 = vadd.f32 %v292_v1, %v291_v63 }
 0x224   :  { %v287_v4 = vadd.f32 %v286_v2, %v285_v0  ;;  %v294_v5 = vrot.slane %v293_v3, 1 }
 0x226   :  { %v288_v6 = vmul.f32 0.125, %v287_v4  ;;  %v295_v7 = vadd.f32 %v294_v5, %v293_v3 }
 0x228   :  { %v296_v8 = vmul.f32 0.125, %v295_v7  ;;  %v297_v9 = vmul.f32 %v288_v6, %v288_v6 }
 0x22a   :  { %v298_v10 = vsub.f32 %v296_v8, %v297_v9 }
 0x22c   :  { %v301_v11 = vmax.f32 %v298_v10, 0.0 }
 0x22e   :  { %v302_v12 = vadd.f32 1e-05, %v301_v11 }
 0x230   :  { %474 = vrsqrt.f32 %v302_v12 }
 0x23a   :  { %v475_v14 = vpop.eup %474 }
 0x23b   :  { %v304_v15 = vmul.f32 %v475_v14, %v299_v13 }
 0x23d   :  { %v305_v17 = vmul.f32 %v304_v15, %v288_v6  ;;  %v311_v18 = vrot.slane %v304_v15, %v165_v40 }
 0x23f   :  { %v306_v19 = vsub.f32 %v300_v16, %v305_v17  ;;  %v313_v20 = vmul.f32 %v311_v18, %v276_v54 }
 0x241   :  { %v318_v21 = vrot.slane %v306_v19, %v165_v40 }
 0x243   :  { %v320_v22 = vadd.f32 %v318_v21, %v313_v20 }
 0x245   :  { %v321_v23 = vmax.f32 %v320_v22, 0.0 }
 0x247   :  { %v322_v24 = vpack.c.bf16 %v321_v23, %v321_v23 }
 0x249   :  { %447 = vmatpush3.bf16.xpose.msra.mxu0 %v322_v24 }
 0x250   :  { %449 = vmatmul.mubr.bf16.vlgmr.msra.gmra.mrb[4].mxu0 %v323_v25 }
 0x323   :  { %v368_v27 = vpop.f32.mrb[4].mxu0 }
 0x324   :  { %v369_v28 = vadd.f32 %v368_v27, %v332_v26  ;;  %v450_v29 = vpop.f32.mrb[5].mxu0 }
 0x325   :  { %v371_v30 = vpop.f32.mrb[6].mxu0 }
 0x326   :  { %v451_v31 = vpop.f32.mrb[7].mxu0  ;;  %375 = vst.msk [vmem:[#allocation9] sm:$0xff] %vm374_vm2, %v369_v28 }
 0x327   :  { %553 = shalt.err (!%p550_p0)
}
 0x328   :  { %s554_s13 = scalar_lea.hbm %s710_s9, 128 }
 0x329   :  { %p555_p1 = scmp.ne.s32.totalorder %s710_s9, %s554_s13  ;;  %p558_p2 = scmp.lt.u32.totalorder %s554_s13, %s710_s9 }
 0x32b   :  { %p560_p3 = pnand %p558_p2, %p555_p1 }
 0x32d   :  { %563 = shalt.err (!%p560_p3)
}
 0x32e   :  { %385 = dma.vmem_to_hbm [thread:$0]  %s383_s10, 128, %s710_s9, [#allocation5]  }
 0x32f   :  { %568 = dma.done.wait [#allocation5], 128  }
 0x330   :  { %569 = vsyncadd [#allocation5], 4294967168 }
 0x331   :  { %389 = vsyncpa [#allocation4], 1 }
 0x332   :  { %390 = vsyncpa [#allocation7], 1 }
 0x333   :  { %391 = vsyncpa [#allocation5], 1 }

</bundles_post_ra>
